<compile_context>
chip_gen: v7x
topology: tpu7x:2x2x1
jax: 0.10.0
libtpu: 0.0.40
codegen_flags: <defaults>
</compile_context>

<pallas_src>
import jax
import jax.numpy as jnp
from jax import lax
from jax.experimental import pallas as pl
from jax.experimental.pallas import tpu as pltpu


# ----------------------------------------------------------------------------
# Row-tiled linear kernel:  y = x @ w.T + b   (MXU, f32 accumulation)
# ----------------------------------------------------------------------------
def _linear_kernel(x_ref, wt_ref, b_ref, y_ref):
    acc = jnp.dot(x_ref[...], wt_ref[...], preferred_element_type=jnp.float32)
    y_ref[...] = (acc + b_ref[...]).astype(y_ref.dtype)


def pallas_linear(x, w, b, *, out_dtype=None, operand_dtype=jnp.bfloat16, tile_m=512):
    """x: (M, K), w: (N, K), b: (N,) -> (M, N). Rows tiled, weights resident."""
    M, K = x.shape
    N = w.shape[0]
    out_dtype = out_dtype if out_dtype is not None else x.dtype
    xo = x.astype(operand_dtype)
    wt = jnp.transpose(w).astype(operand_dtype)          # (K, N), VMEM-resident
    b2 = b.reshape(1, N).astype(jnp.float32)
    tm = M if M <= tile_m else tile_m                    # tile_m is a multiple of 8
    grid = (pl.cdiv(M, tm),)
    return pl.pallas_call(
        _linear_kernel,
        out_shape=jax.ShapeDtypeStruct((M, N), out_dtype),
        grid_spec=pltpu.PrefetchScalarGridSpec(
            num_scalar_prefetch=0,
            grid=grid,
            in_specs=[
                pl.BlockSpec((tm, K), lambda i: (i, 0)),   # streamed row tiles
                pl.BlockSpec((K, N), lambda i: (0, 0)),    # resident weights
                pl.BlockSpec((1, N), lambda i: (0, 0)),    # resident bias
            ],
            out_specs=pl.BlockSpec((tm, N), lambda i: (i, 0)),
        ),
        compiler_params=pltpu.CompilerParams(
            dimension_semantics=("parallel",),
        ),
    )(xo, wt, b2)


# ----------------------------------------------------------------------------
# GRU recurrence — resident variant: whole gi slab in VMEM, in-kernel time loop.
# ----------------------------------------------------------------------------
def _make_gru_resident_kernel(T, B, H, collect_seq):
    def kernel(gi_ref, whh_ref, bhn_ref, y_ref):
        whh = whh_ref[...]                               # (H, 3H) bf16, fused r|z|n
        bhn = bhn_ref[...]                               # (1, H)  f32

        def step(t, h):
            gi = gi_ref[t].astype(jnp.float32)           # (B, 3H)
            gh = jnp.dot(h.astype(jnp.bfloat16), whh,
                         preferred_element_type=jnp.float32)   # one MXU push / step
            r = jax.nn.sigmoid(gi[:, :H] + gh[:, :H])
            z = jax.nn.sigmoid(gi[:, H:2 * H] + gh[:, H:2 * H])
            n = jnp.tanh(gi[:, 2 * H:] + r * (gh[:, 2 * H:] + bhn))
            h_new = (1.0 - z) * n + z * h
            if collect_seq:
                y_ref[t] = h_new.astype(y_ref.dtype)
            return h_new

        h_final = lax.fori_loop(0, T, step, jnp.zeros((B, H), jnp.float32))
        if not collect_seq:
            y_ref[...] = h_final.astype(y_ref.dtype)

    return kernel


# ----------------------------------------------------------------------------
# GRU recurrence — streamed variant: grid over time, hidden state in scratch.
# ----------------------------------------------------------------------------
def _make_gru_streamed_kernel(H):
    def kernel(gi_ref, whh_ref, bhn_ref, y_ref, h_scr):
        t = pl.program_id(0)

        @pl.when(t == 0)
        def _():
            h_scr[...] = jnp.zeros_like(h_scr)

        h = h_scr[...]                                   # (B, H) f32
        gi = gi_ref[0].astype(jnp.float32)               # (B, 3H)
        gh = jnp.dot(h.astype(jnp.bfloat16), whh_ref[...],
                     preferred_element_type=jnp.float32)
        r = jax.nn.sigmoid(gi[:, :H] + gh[:, :H])
        z = jax.nn.sigmoid(gi[:, H:2 * H] + gh[:, H:2 * H])
        n = jnp.tanh(gi[:, 2 * H:] + r * (gh[:, 2 * H:] + bhn_ref[...]))
        h_new = (1.0 - z) * n + z * h
        h_scr[...] = h_new
        y_ref[0] = h_new.astype(y_ref.dtype)

    return kernel


# ----------------------------------------------------------------------------
# One GRU layer / direction, time-major.  x_tm: (T, B, In).
# Returns (T, B, H) sequence (collect_seq=True) or (B, H) final hidden.
# ----------------------------------------------------------------------------
def gru_layer_tm(x_tm, w_ih, w_hh, b_ih, b_hh, h_dim, *,
                 collect_seq=True, force_streamed=False,
                 resident_vmem_budget=8 * 1024 * 1024):
    T, B, In = x_tm.shape
    H = h_dim
    H3 = 3 * H

    # Fold b_hr / b_hz into the input-projection bias (b_hn must stay in-kernel:
    # torch applies it inside the r-gate multiply).
    b_fold = (b_ih + jnp.concatenate(
        [b_hh[:2 * H], jnp.zeros((H,), b_hh.dtype)])).astype(jnp.float32)

    # One GEMM for the input projections of every timestep (bf16 out -> half DMA bytes).
    gi = pallas_linear(x_tm.reshape(T * B, In), w_ih, b_fold,
                       out_dtype=jnp.bfloat16)                     # (T*B, 3H)
    gi = gi.reshape(T, B, H3)

    whh_t = jnp.transpose(w_hh).astype(jnp.bfloat16)               # (H, 3H) fused r|z|n
    bhn = b_hh[2 * H:].reshape(1, H).astype(jnp.float32)

    seq_dtype = jnp.bfloat16
    fin_dtype = jnp.float32

    w_spec = pl.BlockSpec((H, H3), lambda *_: (0, 0))
    b_spec = pl.BlockSpec((1, H), lambda *_: (0, 0))

    gi_bytes = T * B * H3 * 2
    y_bytes = T * B * H * 2 if collect_seq else B * H * 4
    use_resident = (not force_streamed) and (gi_bytes + y_bytes <= resident_vmem_budget)

    if use_resident:
        # Whole gi slab VMEM-resident; time loop inside the kernel (no per-step
        # grid overhead, no per-step DMA descriptors).
        if collect_seq:
            out_shape = jax.ShapeDtypeStruct((T, B, H), seq_dtype)
            out_spec = pl.BlockSpec((T, B, H), lambda *_: (0, 0, 0))
        else:
            out_shape = jax.ShapeDtypeStruct((B, H), fin_dtype)
            out_spec = pl.BlockSpec((B, H), lambda *_: (0, 0))
        return pl.pallas_call(
            _make_gru_resident_kernel(T, B, H, collect_seq),
            out_shape=out_shape,
            grid_spec=pltpu.PrefetchScalarGridSpec(
                num_scalar_prefetch=0,
                grid=(1,),
                in_specs=[pl.BlockSpec((T, B, H3), lambda *_: (0, 0, 0)),
                          w_spec, b_spec],
                out_specs=out_spec,
            ),
            compiler_params=pltpu.CompilerParams(
                dimension_semantics=("arbitrary",),
            ),
        )(gi, whh_t, bhn)

    # Streamed variant: one (1, B, 3H) block per step (single DMA per step).
    step_idx = lambda t: (t, 0, 0)
    try:
        gi_spec = pl.BlockSpec((1, B, H3), step_idx, pipeline_mode=pl.Buffered(3))
    except Exception:  # pipeline_mode / Buffered not available in this jax build
        gi_spec = pl.BlockSpec((1, B, H3), step_idx)

    if collect_seq:
        out_shape = jax.ShapeDtypeStruct((T, B, H), seq_dtype)
        out_spec = pl.BlockSpec((1, B, H), lambda t: (t, 0, 0))
    else:
        # Fixed output block: only the final hidden is written back to HBM.
        out_shape = jax.ShapeDtypeStruct((1, B, H), fin_dtype)
        out_spec = pl.BlockSpec((1, B, H), lambda t: (0, 0, 0))

    y = pl.pallas_call(
        _make_gru_streamed_kernel(H),
        out_shape=out_shape,
        grid_spec=pltpu.PrefetchScalarGridSpec(
            num_scalar_prefetch=0,
            grid=(T,),
            in_specs=[gi_spec, w_spec, b_spec],
            out_specs=out_spec,
            scratch_shapes=[pltpu.VMEM((B, H), jnp.float32)],      # hidden-state carry
        ),
        compiler_params=pltpu.CompilerParams(
            dimension_semantics=("arbitrary",),                    # sequential recurrence
        ),
    )(gi, whh_t, bhn)
    if not collect_seq:
        y = y[0]
    return y


# ----------------------------------------------------------------------------
# Full GRUEncoder forward (multi-layer, optionally bidirectional), time-major.
# ----------------------------------------------------------------------------
def gru_encoder_forward(x, params, *, h_dim, layers, bigru,
                        single_output=False, force_streamed=False):
    num_dir = 2 if bigru else 1
    layer_in = jnp.transpose(x, (1, 0, 2))                         # (T, B, E), once
    finals = None
    for l in range(layers):
        is_last = (l == layers - 1)
        outs, fins = [], []
        for d in range(num_dir):
            p = params["rnn"][(l, d)]
            xi = layer_in if d == 0 else layer_in[::-1]            # reverse time for bwd dir
            y = gru_layer_tm(xi, p["w_ih"], p["w_hh"], p["b_ih"], p["b_hh"], h_dim,
                             collect_seq=not is_last,
                             force_streamed=force_streamed)
            if is_last:
                fins.append(y)                                     # (B, H) final hidden
            else:
                outs.append(y if d == 0 else y[::-1])              # re-align to time order
        if not is_last:
            layer_in = outs[0] if num_dir == 1 else jnp.concatenate(outs, axis=-1)
        finals = fins
        # TODO(synk): inter-layer dropout (p_dropout) is train-only; eval forward skips it.

    # torch: h[-2] (last layer fwd) concat h[-1] (last layer bwd)
    h = finals[0] if num_dir == 1 else jnp.concatenate(finals, axis=-1)

    mu = pallas_linear(h, params["q_mu"]["w"], params["q_mu"]["b"],
                       out_dtype=jnp.float32, operand_dtype=jnp.float32)
    if single_output:
        return mu
    logvar = pallas_linear(h, params["q_logvar"]["w"], params["q_logvar"]["b"],
                           out_dtype=jnp.float32, operand_dtype=jnp.float32)
    return mu, logvar


# ----------------------------------------------------------------------------
# Pure-JAX reference (mirrors torch.nn.GRU math) for validation.
# ----------------------------------------------------------------------------
def _ref_gru_layer(x, w_ih, w_hh, b_ih, b_hh, H):
    B, T, _ = x.shape
    h = jnp.zeros((B, H), jnp.float32)
    ys = []
    for t in range(T):
        gi = x[:, t, :] @ w_ih.T + b_ih
        gh = h @ w_hh.T + b_hh
        r = jax.nn.sigmoid(gi[:, :H] + gh[:, :H])
        z = jax.nn.sigmoid(gi[:, H:2 * H] + gh[:, H:2 * H])
        n = jnp.tanh(gi[:, 2 * H:] + r * gh[:, 2 * H:])
        h = (1.0 - z) * n + z * h
        ys.append(h)
    return jnp.stack(ys, axis=1)


def _ref_encoder(x, params, *, h_dim, layers, bigru, single_output=False):
    num_dir = 2 if bigru else 1
    layer_in = x
    last_finals = None
    for l in range(layers):
        outs, finals = [], []
        for d in range(num_dir):
            p = params["rnn"][(l, d)]
            xi = layer_in if d == 0 else layer_in[:, ::-1, :]
            y = _ref_gru_layer(xi, p["w_ih"], p["w_hh"], p["b_ih"], p["b_hh"], h_dim)
            finals.append(y[:, -1, :])
            outs.append(y if d == 0 else y[:, ::-1, :])
        layer_in = outs[0] if num_dir == 1 else jnp.concatenate(outs, axis=-1)
        last_finals = finals
    h = last_finals[0] if num_dir == 1 else jnp.concatenate(last_finals, axis=-1)
    mu = h @ params["q_mu"]["w"].T + params["q_mu"]["b"]
    if single_output:
        return mu
    logvar = h @ params["q_logvar"]["w"].T + params["q_logvar"]["b"]
    return mu, logvar


if __name__ == "__main__":
    # Small deterministic config: batch=2, seq=8, emb=32, hidden=32, z=16,
    # 2 layers, bidirectional.
    B, T, E, H, Z = 2, 8, 32, 32, 16
    LAYERS, BIGRU = 2, True
    num_dir = 2 if BIGRU else 1
    scale = 0.1

    key = jax.random.PRNGKey(0)
    params = {"rnn": {}}
    for l in range(LAYERS):
        in_dim = E if l == 0 else num_dir * H
        for d in range(num_dir):
            key, k1, k2, k3, k4 = jax.random.split(key, 5)
            params["rnn"][(l, d)] = {
                "w_ih": scale * jax.random.normal(k1, (3 * H, in_dim), jnp.float32),
                "w_hh": scale * jax.random.normal(k2, (3 * H, H), jnp.float32),
                "b_ih": scale * jax.random.normal(k3, (3 * H,), jnp.float32),
                "b_hh": scale * jax.random.normal(k4, (3 * H,), jnp.float32),
            }
    key, k1, k2, k3, k4, kx = jax.random.split(key, 6)
    params["q_mu"] = {
        "w": scale * jax.random.normal(k1, (Z, num_dir * H), jnp.float32),
        "b": scale * jax.random.normal(k2, (Z,), jnp.float32),
    }
    params["q_logvar"] = {
        "w": scale * jax.random.normal(k3, (Z, num_dir * H), jnp.float32),
        "b": scale * jax.random.normal(k4, (Z,), jnp.float32),
    }

    x = jax.random.normal(kx, (B, T, E), jnp.float32)

    # Default path: fully VMEM-resident recurrence (in-kernel time loop).
    mu, logvar = gru_encoder_forward(x, params, h_dim=H, layers=LAYERS, bigru=BIGRU)
    # Also exercise the streamed (grid-over-time) recurrence path.
    mu_s, logvar_s = gru_encoder_forward(x, params, h_dim=H, layers=LAYERS, bigru=BIGRU,
                                         force_streamed=True)
    mu, logvar, mu_s, logvar_s = jax.block_until_ready((mu, logvar, mu_s, logvar_s))

    assert mu.shape == (B, Z) and logvar.shape == (B, Z)
    assert mu.dtype == jnp.float32 and logvar.dtype == jnp.float32
    assert bool(jnp.all(jnp.isfinite(mu))) and bool(jnp.all(jnp.isfinite(logvar)))

    # Resident and streamed paths compute the same math — must agree closely.
    assert bool(jnp.allclose(mu, mu_s, atol=1e-3, rtol=1e-3)), "resident vs streamed mu mismatch"
    assert bool(jnp.allclose(logvar, logvar_s, atol=1e-3, rtol=1e-3)), "resident vs streamed logvar mismatch"

    # Validate against the pure-JAX f32 reference (bf16 MXU operands -> loose tol).
    mu_ref, lv_ref = _ref_encoder(x, params, h_dim=H, layers=LAYERS, bigru=BIGRU)
    assert bool(jnp.allclose(mu, mu_ref, atol=3e-2, rtol=3e-2)), "mu mismatch vs reference"
    assert bool(jnp.allclose(logvar, lv_ref, atol=3e-2, rtol=3e-2)), "logvar mismatch vs reference"

    print("KERNEL_OK")
</pallas_src>

<mosaic_0001>
module attributes {stable_mosaic.version = 11 : i64} {
  func.func @_linear_kernel(%arg0: i32, %arg1: memref<16x32xbf16, #tpu.memory_space<vmem>>, %arg2: memref<32x96xbf16, #tpu.memory_space<vmem>>, %arg3: memref<1x96xf32, #tpu.memory_space<vmem>>, %arg4: memref<16x96xbf16, #tpu.memory_space<vmem>>) attributes {dimension_semantics = [#tpu.dimension_semantics<parallel>], iteration_bounds = array<i64: 1>, scalar_prefetch = 0 : i64, scratch_operands = 0 : i64, tpu.core_type = #tpu.core_type<tc>, window_params = [{transform_indices = @transform_0, window_bounds = array<i64: 16, 32>}, {pipeline_mode = #tpu.pipeline_mode<synchronous>, transform_indices = @transform_1, window_bounds = array<i64: 32, 96>}, {pipeline_mode = #tpu.pipeline_mode<synchronous>, transform_indices = @transform_2, window_bounds = array<i64: 1, 96>}, {transform_indices = @transform_3, window_bounds = array<i64: 16, 96>}]} {
    %c0 = arith.constant 0 : index
    %c0_0 = arith.constant 0 : index
    %0 = vector.load %arg1[%c0, %c0_0] : memref<16x32xbf16, #tpu.memory_space<vmem>>, vector<16x32xbf16>
    %c0_1 = arith.constant 0 : index
    %c0_2 = arith.constant 0 : index
    %1 = vector.load %arg2[%c0_1, %c0_2] : memref<32x96xbf16, #tpu.memory_space<vmem>>, vector<32x96xbf16>
    %cst = arith.constant dense<0.000000e+00> : vector<16x96xf32>
    %2 = tpu.matmul %0, %1, %cst {dimension_numbers = #tpu.dot_dimension_numbers<[1], [0], [0], [1], [0, 0, 1, 1], [], []>} : vector<16x32xbf16>, vector<32x96xbf16>, vector<16x96xf32> -> vector<16x96xf32>
    %c0_3 = arith.constant 0 : index
    %c0_4 = arith.constant 0 : index
    %3 = vector.load %arg3[%c0_3, %c0_4] : memref<1x96xf32, #tpu.memory_space<vmem>>, vector<1x96xf32>
    %4 = vector.broadcast %3 : vector<1x96xf32> to vector<16x96xf32>
    %5 = arith.addf %2, %4 : vector<16x96xf32>
    %6 = arith.truncf %5 : vector<16x96xf32> to vector<16x96xbf16>
    %c0_5 = arith.constant 0 : index
    %c0_6 = arith.constant 0 : index
    %7 = vector.load %arg4[%c0_5, %c0_6] : memref<16x96xbf16, #tpu.memory_space<vmem>>, vector<16x96xbf16>
    tpu.vector_store %arg4[%c0_5, %c0_6], %6 {strides = array<i32>} : memref<16x96xbf16, #tpu.memory_space<vmem>>, vector<16x96xbf16>,
    return
  }
  func.func @transform_0(%arg0: i32) -> (i32, i32) {
    %c0_i32 = arith.constant 0 : i32
    %c0_i32_0 = arith.constant 0 : i32
    return %arg0, %c0_i32 : i32, i32
  }
  func.func @transform_1(%arg0: i32) -> (i32, i32) {
    %c0_i32 = arith.constant 0 : i32
    %c0_i32_0 = arith.constant 0 : i32
    %c0_i32_1 = arith.constant 0 : i32
    return %c0_i32, %c0_i32_0 : i32, i32
  }
  func.func @transform_2(%arg0: i32) -> (i32, i32) {
    %c0_i32 = arith.constant 0 : i32
    %c0_i32_0 = arith.constant 0 : i32
    %c0_i32_1 = arith.constant 0 : i32
    return %c0_i32, %c0_i32_0 : i32, i32
  }
  func.func @transform_3(%arg0: i32) -> (i32, i32) {
    %c0_i32 = arith.constant 0 : i32
    %c0_i32_0 = arith.constant 0 : i32
    return %arg0, %c0_i32 : i32, i32
  }
}

</mosaic_0001>

<bundles_post_ra>
// kernel: tpu_custom_call.1
= control target key start
LH: loop header
LB: loop body
LE: loop exit
PB: predicated region body
PF: predicated region fallthrough
CT: control target
= control target key end

     0   :  { %8 = vsyncpa [#allocation3], 0  ;;  %s325_s0 = inlined_call_operand.hbm [shape: bf16[16,32], index: 0, kind: input, shape index: {}]   ;;  %s326_s1 = inlined_call_operand.hbm [shape: bf16[32,96], index: 1, kind: input, shape index: {}]   ;;  %s327_s2 = inlined_call_operand.vmem [shape: f32[1,96], index: 2, kind: input, shape index: {}]   ;;  %s328_s3 = inlined_call_operand.hbm [shape: bf16[16,96], index: 3, kind: output, shape index: {}]  }
   0x1   :  { %9 = vsyncpa [#allocation6], 0 }
   0x2   :  { %10 = vsyncpa [#allocation4], 0  ;;  %s250_s12 = smov [#allocation2]   ;;  %s178_s16 = scalar_lea.hbm %s325_s0, 128 }
   0x3   :  { %s16_s13 = sshll.u32 %s250_s12, 4  ;;  %p179_p0 = scmp.ne.s32.totalorder %s325_s0, %s178_s16  ;;  %s17_s13 = int_to_ptr.vmem [resolvable:$true] %s16_s13 }
   0x4   :  { %p182_p1 = scmp.lt.u32.totalorder %s178_s16, %s325_s0 }
   0x6   :  { %p184_p2 = pnand %p182_p1, %p179_p0 }
   0x8   :  { %187 = shalt.err (!%p184_p2)
}
   0x9   :  { %s188_s21 = scalar_lea.vmem %s17_s13, 128  ;;  %p193_p4 = scmp.lt.s32.totalorder %s17_s13, %s17_s13 }
   0xa   :  { %p189_p3 = scmp.ne.s32.totalorder %s17_s13, %s188_s21  ;;  %p194_p5 = scmp.lt.s32.totalorder %s188_s21, %s188_s21 }
   0xc   :  { %p195_p6 = por %p194_p5, %p193_p4 }
   0xe   :  { %p196_p7 = pnand %p195_p6, %p189_p3 }
  0x10   :  { %199 = shalt.err (!%p196_p7)
}
  0x11   :  { %s251_s22 = smov 64   ;;  %s252_s23 = smov 4  }
  0x12   :  { %22 = dma.hbm_to_vmem [thread:$0]  %s325_s0, 128, %s17_s13, [#allocation3], %s251_s22, %s251_s22, %s252_s23  }
  0x13   :  { %s253_s26 = smov [#allocation5]   ;;  %s200_s30 = scalar_lea.hbm %s326_s1, 256 }
  0x14   :  { %s28_s27 = sshll.u32 %s253_s26, 4  ;;  %p201_p8 = scmp.ne.s32.totalorder %s326_s1, %s200_s30  ;;  %s29_s27 = int_to_ptr.vmem [resolvable:$true] %s28_s27 }
  0x15   :  { %p204_p9 = scmp.lt.u32.totalorder %s200_s30, %s326_s1 }
  0x17   :  { %p206_p10 = pnand %p204_p9, %p201_p8 }
  0x19   :  { %209 = shalt.err (!%p206_p10)
}
  0x1a   :  { %s210_s8 = scalar_lea.vmem %s29_s27, 256  ;;  %p215_p12 = scmp.lt.s32.totalorder %s29_s27, %s29_s27 }
  0x1b   :  { %p211_p11 = scmp.ne.s32.totalorder %s29_s27, %s210_s8  ;;  %p216_p13 = scmp.lt.s32.totalorder %s210_s8, %s210_s8 }
  0x1d   :  { %p217_p0 = por %p216_p13, %p215_p12 }
  0x1f   :  { %p218_p1 = pnand %p217_p0, %p211_p11 }
  0x21   :  { %221 = shalt.err (!%p218_p1)
}
  0x22   :  { %34 = dma.hbm_to_vmem [thread:$0]  %s326_s1, 256, %s29_s27, [#allocation6], %s251_s22, %s251_s22, %s252_s23  }
  0x23   :  { %244 = dma.done.wait [#allocation3], 128  }
  0x24   :  { %245 = vsyncadd [#allocation3], 4294967168 }
  0x25   :  { %246 = dma.done.wait [#allocation6], 256  }
  0x26   :  { %247 = vsyncadd [#allocation6], 4294967040  ;;  %v254_v0 = vmov 0.0   ;;  %vm255_vm0 = vmmov 0   ;;  %v175_v1 = vld [vmem:[#allocation5] sm:$0xff]   ;;  %v176_v2 = vld [vmem:[#allocation5 + $0x8] sm:$0xff]  }
  0x27   :  { %160 = vmatprep.subr.bf16.mxu0 %v254_v0  ;;  %164 = vmatprep.mubr.msk.bf16.mxu0 %vm255_vm0, %v254_v0  ;;  %v177_v3 = vld [vmem:[#allocation2] sm:$0xff]   ;;  %vm74_vm1 = vcmask 261120   ;;  %vm127_vm2 = vcmask 781312   ;;  %s256_s1 = smov [#allocation7]  }
  0x28   :  { %161 = vmatpush3.bf16.msra.mxu0 %v175_v1  ;;  %v148_v4 = vld [vmem:[%s327_s2] ss:$0 sm:$0xff]  ;;  %s135_s12 = sshll.u32 %s256_s1, 4  ;;  %s136_s12 = int_to_ptr.vmem [resolvable:$true] %s135_s12 }
  0x29   :  { %162 = vmatprep.subr.bf16.mxu0 %v254_v0  ;;  %s222_s13 = scalar_lea.vmem %s136_s12, 128  ;;  %p227_p3 = scmp.lt.s32.totalorder %s136_s12, %s136_s12 }
  0x2a   :  { %p223_p2 = scmp.ne.s32.totalorder %s136_s12, %s222_s13  ;;  %p228_p4 = scmp.lt.s32.totalorder %s222_s13, %s222_s13 }
  0x2c   :  { %163 = vmatpush3.bf16.msra.mxu0 %v176_v2  ;;  %p229_p5 = por %p228_p4, %p227_p3 }
  0x2e   :  { %p230_p6 = pnand %p229_p5, %p223_p2 }
  0x2f   :  { %165 = vmatmul.mubr.msk.bf16.vlgmr.msra.gmra.mrb[0].mxu0 %vm74_vm1, %v177_v3 }
 0x102   :  { %v112_v5 = vpop.f32.mrb[0].mxu0 }
 0x103   :  { %v113_v6 = vadd.f32 %v148_v4, %v112_v5  ;;  %v166_v7 = vpop.f32.mrb[1].mxu0 }
 0x104   :  { %v115_v8 = vpop.f32.mrb[2].mxu0 }
 0x105   :  { %v155_v9 = vpack.c.bf16 %v113_v6, %v113_v6  ;;  %v116_v10 = vadd.f32 %v148_v4, %v115_v8  ;;  %v167_v11 = vpop.f32.mrb[3].mxu0 }
 0x107   :  { %v156_v12 = vpack.c.bf16 %v116_v10, %v116_v10  ;;  %128 = vst.msk [vmem:[#allocation7] sm:$0xf] %vm127_vm2, %v155_v9 }
 0x109   :  { %129 = vst.msk [vmem:[#allocation7 + $0x4] sm:$0xf] %vm127_vm2, %v156_v12 }
 0x10a   :  { %233 = shalt.err (!%p230_p6)
}
 0x10b   :  { %s234_s15 = scalar_lea.hbm %s328_s3, 128 }
 0x10c   :  { %p235_p7 = scmp.ne.s32.totalorder %s328_s3, %s234_s15  ;;  %p238_p8 = scmp.lt.u32.totalorder %s234_s15, %s328_s3 }
 0x10e   :  { %p240_p9 = pnand %p238_p8, %p235_p7 }
 0x110   :  { %243 = shalt.err (!%p240_p9)
}
 0x111   :  { %141 = dma.vmem_to_hbm [thread:$0]  %s136_s12, 128, %s328_s3, [#allocation4], %s251_s22, %s251_s22, %s252_s23  }
 0x112   :  { %248 = dma.done.wait [#allocation4], 128  }
 0x113   :  { %249 = vsyncadd [#allocation4], 4294967168 }
 0x114   :  { %145 = vsyncpa [#allocation3], 1 }
 0x115   :  { %146 = vsyncpa [#allocation6], 1 }
 0x116   :  { %147 = vsyncpa [#allocation4], 1 }

</bundles_post_ra>
